<compile_context>
chip_gen: v5e
topology: v5e:2x2
jax: 0.10.0
libtpu: 0.0.40
codegen_flags: <defaults>
</compile_context>

<pallas_src>
import jax
import jax.numpy as jnp
from jax.experimental import pallas as pl
from jax.experimental.pallas import tpu as pltpu

LN_EPS = 1e-5
_MIN_PALLAS_ROWS = 64               # below this a pallas_call is pure overhead
_VMEM_HEADROOM = 16 * 1024 * 1024   # leave room for compiler-internal scratch


def _round_up(x, m):
    return ((x + m - 1) // m) * m


def _vmem_capacity_bytes():
    """Physical per-core VMEM (128 MiB on v5e/v6e, 64 MiB on v7x)."""
    try:
        cap = getattr(pltpu.get_tpu_info(), "vmem_capacity_bytes", None)
        if cap:
            return int(cap)
    except Exception:
        pass
    return 64 * 1024 * 1024          # conservative (v7x) fallback


def _pick_tile_k(d_in):
    """Largest convenient K tile that divides d_in (None -> keep weight resident)."""
    for c in (2048, 1024, 512, 256, 128):
        if d_in % c == 0:
            return c
    return None


# ---------------------------------------------------------------------------
# Kernels
# ---------------------------------------------------------------------------

def _proj_ln_tail(y_f32, params, out_dtype):
    """Bias + LayerNorm on an f32 (tile_m, d_out) block.

    params is the packed (8, d_out) operand: row 0 = bias, 1 = gamma, 2 = beta.
    """
    p = params.astype(jnp.float32)
    y = y_f32 + p[0:1, :]
    inv_d = jnp.float32(1.0 / y.shape[-1])
    s = jnp.sum(y, axis=-1, keepdims=True)
    ss = jnp.sum(y * y, axis=-1, keepdims=True)
    mean = s * inv_d
    # Single-pass variance can cancel slightly negative in f32 -> clamp.
    var = jnp.maximum(ss * inv_d - mean * mean, 0.0)
    y_hat = (y - mean) * jax.lax.rsqrt(var + LN_EPS)
    return (y_hat * p[1:2, :] + p[2:3, :]).astype(out_dtype)


def _proj_ln_kernel(x_ref, w_ref, p_ref, o_ref):
    """Fused Linear + LayerNorm, weight fully resident."""
    y = jnp.dot(x_ref[...], w_ref[...], preferred_element_type=jnp.float32)
    o_ref[...] = _proj_ln_tail(y, p_ref[...], o_ref.dtype)


def _proj_ln_kernel_ktiled(x_ref, w_ref, p_ref, o_ref, acc_ref):
    """Fused Linear + LayerNorm with K-tiled weight and f32 accumulator."""
    k = pl.program_id(1)

    @pl.when(k == 0)
    def _():
        acc_ref[...] = jnp.zeros_like(acc_ref)

    acc_ref[...] += jnp.dot(x_ref[...], w_ref[...],
                            preferred_element_type=jnp.float32)

    @pl.when(k == pl.num_programs(1) - 1)
    def _():
        o_ref[...] = _proj_ln_tail(acc_ref[...], p_ref[...], o_ref.dtype)


# ---------------------------------------------------------------------------
# pallas_call wrapper
# ---------------------------------------------------------------------------

def _spec(shape, index_map, nbuf=None):
    if nbuf is None:
        return pl.BlockSpec(shape, index_map)
    return pl.BlockSpec(shape, index_map, pipeline_mode=pl.Buffered(nbuf))


def _pallas_linear_layernorm(x2d, w, param_pack, *, tile_k, buffer_invariants):
    M, d_in = x2d.shape
    d_out = w.shape[1]
    x_bytes = x2d.dtype.itemsize
    w_bytes = w.dtype.itemsize

    cap = _vmem_capacity_bytes()
    budget = cap - _VMEM_HEADROOM

    use_k = tile_k is not None
    if use_k:
        assert d_in % tile_k == 0
        weight_vmem = 2 * tile_k * d_out * w_bytes          # double-buffered tiles
        k_width = tile_k
    else:
        w_nbuf = 1 if buffer_invariants else 2
        weight_vmem = w_nbuf * d_in * d_out * w_bytes        # resident weight
        k_width = d_in

    # Largest row tile whose working set fits the per-chip VMEM budget.
    # (No forced splitting of small row counts: on single-TC v5e/v6e it only
    # adds per-step overhead; for large M the grid is naturally > 1.)
    tile_m, vmem_need = 8, 0
    tmp_factor = 5 if use_k else 4                           # y/LN temps (+acc)
    for cand in (512, 256, 128, 64, 32, 16, 8):
        t = min(cand, _round_up(M, 8))
        need = (2 * t * k_width * x_bytes                    # x tile (dbl-buf)
                + weight_vmem
                + 2 * t * d_out * x_bytes                    # out tile (dbl-buf)
                + tmp_factor * t * d_out * 4                 # f32 temporaries
                + 8 * d_out * 4)                             # packed params
        if need <= budget or cand == 8:
            tile_m, vmem_need = t, need
            break
    grid_m = pl.cdiv(M, tile_m)

    vmem_limit = int(min(max(vmem_need + (4 << 20), 32 << 20), budget))

    cost = pl.CostEstimate(
        flops=2 * M * d_in * d_out,
        transcendentals=M,                                   # one rsqrt per row
        bytes_accessed=(M * d_in * x_bytes + d_in * d_out * w_bytes
                        + M * d_out * x_bytes + 8 * d_out * 4),
    )

    inv_nbuf = 1 if buffer_invariants else None              # grid-invariant ops

    if not use_k:
        grid = (grid_m,)
        in_specs = [
            _spec((tile_m, d_in), lambda i: (i, 0)),
            _spec((d_in, d_out), lambda i: (0, 0), inv_nbuf),
            _spec((8, d_out), lambda i: (0, 0), inv_nbuf),
        ]
        out_specs = pl.BlockSpec((tile_m, d_out), lambda i: (i, 0))
        scratch_shapes = []
        kernel = _proj_ln_kernel
        dims = ("parallel",)
    else:
        grid_k = d_in // tile_k
        grid = (grid_m, grid_k)                              # reduction axis last
        in_specs = [
            _spec((tile_m, tile_k), lambda i, k: (i, k)),
            _spec((tile_k, d_out), lambda i, k: (k, 0)),
            _spec((8, d_out), lambda i, k: (0, 0), inv_nbuf),
        ]
        out_specs = pl.BlockSpec((tile_m, d_out), lambda i, k: (i, 0))
        scratch_shapes = [pltpu.VMEM((tile_m, d_out), jnp.float32)]
        kernel = _proj_ln_kernel_ktiled
        dims = ("parallel", "arbitrary")

    return pl.pallas_call(
        kernel,
        out_shape=jax.ShapeDtypeStruct((M, d_out), x2d.dtype),
        grid_spec=pltpu.PrefetchScalarGridSpec(
            num_scalar_prefetch=0,
            grid=grid,
            in_specs=in_specs,
            out_specs=out_specs,
            scratch_shapes=scratch_shapes,
        ),
        compiler_params=pltpu.CompilerParams(
            dimension_semantics=dims,
            vmem_limit_bytes=vmem_limit,
        ),
        cost_estimate=cost,
    )(x2d, w, param_pack)


def linear_layernorm(x2d, w, b, gamma, beta, *, tile_k=None,
                     min_pallas_rows=_MIN_PALLAS_ROWS):
    """Fused Linear + LayerNorm: (M, D_in) @ (D_in, D_out) -> LN -> (M, D_out)."""
    M, d_in = x2d.shape
    d_out = w.shape[1]

    # Tiny row counts (e.g. the (B, Da) audio path): a dedicated pallas_call is
    # pure launch/prologue overhead plus a weight DMA; let XLA handle it.
    if M < min_pallas_rows and tile_k is None:
        y = x2d.astype(jnp.float32) @ w.astype(jnp.float32) + b
        mean = jnp.mean(y, axis=-1, keepdims=True)
        var = jnp.mean(jnp.square(y - mean), axis=-1, keepdims=True)
        y = (y - mean) * jax.lax.rsqrt(var + LN_EPS) * gamma + beta
        return y.astype(x2d.dtype)

    # Pack (bias, gamma, beta) into a single full-sublane (8, d_out) operand.
    param_pack = jnp.zeros((8, d_out), jnp.float32)
    param_pack = param_pack.at[0].set(b.astype(jnp.float32))
    param_pack = param_pack.at[1].set(gamma.astype(jnp.float32))
    param_pack = param_pack.at[2].set(beta.astype(jnp.float32))

    # K-tile the weight only when keeping it resident would blow the per-chip
    # VMEM budget (mainly very large d_in on v7x's 64 MiB VMEM).
    cap = _vmem_capacity_bytes()
    weight_bytes = d_in * d_out * w.dtype.itemsize
    if tile_k is None:
        if weight_bytes > (cap - _VMEM_HEADROOM) // 2:
            tile_k = _pick_tile_k(d_in)
    elif d_in % tile_k != 0:
        tile_k = _pick_tile_k(d_in)

    try:
        return _pallas_linear_layernorm(x2d, w, param_pack, tile_k=tile_k,
                                        buffer_invariants=True)
    except Exception:
        # Some jax versions reject Buffered(1); retry with default buffering.
        return _pallas_linear_layernorm(x2d, w, param_pack, tile_k=tile_k,
                                        buffer_invariants=False)


# ---------------------------------------------------------------------------
# Module parameters / forward
# ---------------------------------------------------------------------------

class FeatureAdapterParams:
    """Deterministic synthetic parameters mirroring the PyTorch module."""

    def __init__(self, key, video_dim, audio_dim, latent_dim):
        kv_w, kv_b, ka_w, ka_b = jax.random.split(key, 4)
        sv = 1.0 / (video_dim ** 0.5)
        sa = 1.0 / (audio_dim ** 0.5)
        # Linear weights stored as (D_in, D_out).
        self.video_w = jax.random.uniform(
            kv_w, (video_dim, latent_dim), jnp.float32, -sv, sv)
        self.video_b = jax.random.uniform(
            kv_b, (latent_dim,), jnp.float32, -sv, sv)
        self.audio_w = jax.random.uniform(
            ka_w, (audio_dim, latent_dim), jnp.float32, -sa, sa)
        self.audio_b = jax.random.uniform(
            ka_b, (latent_dim,), jnp.float32, -sa, sa)
        # LayerNorm affine params (PyTorch init: ones / zeros).
        self.video_gamma = jnp.ones((latent_dim,), jnp.float32)
        self.video_beta = jnp.zeros((latent_dim,), jnp.float32)
        self.audio_gamma = jnp.ones((latent_dim,), jnp.float32)
        self.audio_beta = jnp.zeros((latent_dim,), jnp.float32)


def feature_adapter_forward(params, video_feat, audio_feat):
    """video_feat: (B, T, video_dim); audio_feat: (B, audio_dim).
    Returns (video_proj (B, T, L), audio_proj (B, 1, L))."""
    B, T, Dv = video_feat.shape
    video2d = video_feat.reshape(B * T, Dv)
    video_proj = linear_layernorm(
        video2d, params.video_w, params.video_b,
        params.video_gamma, params.video_beta).reshape(B, T, -1)

    # Audio path has only B rows -> routed through the jnp fast path inside
    # linear_layernorm (a pallas_call would be pure overhead at this size).
    audio_proj = linear_layernorm(
        audio_feat, params.audio_w, params.audio_b,
        params.audio_gamma, params.audio_beta)
    audio_proj = audio_proj[:, None, :]  # unsqueeze(1)
    return video_proj, audio_proj


# ---------------------------------------------------------------------------
# Pure-JAX reference + self-test
# ---------------------------------------------------------------------------

def _proj_ln_ref(x, w, b, g, beta):
    y = x @ w + b
    mean = jnp.mean(y, axis=-1, keepdims=True)
    var = jnp.mean((y - mean) ** 2, axis=-1, keepdims=True)
    return (y - mean) / jnp.sqrt(var + LN_EPS) * g + beta


def _reference_forward(params, video_feat, audio_feat):
    vp = _proj_ln_ref(video_feat, params.video_w, params.video_b,
                      params.video_gamma, params.video_beta)
    ap = _proj_ln_ref(audio_feat, params.audio_w, params.audio_b,
                      params.audio_gamma, params.audio_beta)[:, None, :]
    return vp, ap


if __name__ == "__main__":
    # Small shapes consistent with the module's forward:
    #   video_feat: (B, T, video_dim), audio_feat: (B, audio_dim)
    B, T = 2, 32
    video_dim, audio_dim, latent_dim = 256, 384, 128

    key = jax.random.PRNGKey(0)
    k_params, k_video, k_audio = jax.random.split(key, 3)

    params = FeatureAdapterParams(k_params, video_dim, audio_dim, latent_dim)
    video_feat = jax.random.normal(k_video, (B, T, video_dim), jnp.float32)
    audio_feat = jax.random.normal(k_audio, (B, audio_dim), jnp.float32)

    video_proj, audio_proj = feature_adapter_forward(
        params, video_feat, audio_feat)
    jax.block_until_ready(video_proj)
    jax.block_until_ready(audio_proj)

    vp_ref, ap_ref = _reference_forward(params, video_feat, audio_feat)
    assert video_proj.shape == (B, T, latent_dim)
    assert audio_proj.shape == (B, 1, latent_dim)
    assert jnp.allclose(video_proj, vp_ref, atol=1e-4, rtol=1e-4)
    assert jnp.allclose(audio_proj, ap_ref, atol=1e-4, rtol=1e-4)

    # Exercise the K-tiled accumulator path (used for huge d_in on v7x).
    vp_ktiled = linear_layernorm(
        video_feat.reshape(B * T, video_dim), params.video_w, params.video_b,
        params.video_gamma, params.video_beta, tile_k=128,
    ).reshape(B, T, latent_dim)
    jax.block_until_ready(vp_ktiled)
    assert jnp.allclose(vp_ktiled, vp_ref, atol=1e-4, rtol=1e-4)

    # bf16 input path sanity check (reference uses the same bf16-quantized
    # operands upcast to f32, so only MXU rounding + output cast differ).
    x_bf = video_feat.reshape(B * T, video_dim).astype(jnp.bfloat16)
    w_bf = params.video_w.astype(jnp.bfloat16)
    vp_bf16 = linear_layernorm(
        x_bf, w_bf, params.video_b, params.video_gamma, params.video_beta)
    jax.block_until_ready(vp_bf16)
    ref_bf = _proj_ln_ref(x_bf.astype(jnp.float32), w_bf.astype(jnp.float32),
                          params.video_b, params.video_gamma, params.video_beta)
    assert vp_bf16.dtype == jnp.bfloat16
    assert jnp.allclose(vp_bf16.astype(jnp.float32), ref_bf,
                        atol=2e-2, rtol=2e-2)

    print("KERNEL_OK")
</pallas_src>

<mosaic_0001>
module attributes {stable_mosaic.version = 11 : i64} {
  func.func @_proj_ln_kernel(%arg0: i32, %arg1: memref<64x256xf32, #tpu.memory_space<vmem>>, %arg2: memref<256x128xf32, #tpu.memory_space<vmem>>, %arg3: memref<8x128xf32, #tpu.memory_space<vmem>>, %arg4: memref<64x128xf32, #tpu.memory_space<vmem>>) attributes {dimension_semantics = [#tpu.dimension_semantics<parallel>], iteration_bounds = array<i64: 1>, scalar_prefetch = 0 : i64, scratch_operands = 0 : i64, tpu.core_type = #tpu.core_type<tc>, window_params = [{transform_indices = @transform_0, window_bounds = array<i64: 64, 256>}, {pipeline_mode = #tpu.pipeline_mode<synchronous>, transform_indices = @transform_1, window_bounds = array<i64: 256, 128>}, {pipeline_mode = #tpu.pipeline_mode<synchronous>, transform_indices = @transform_2, window_bounds = array<i64: 8, 128>}, {transform_indices = @transform_3, window_bounds = array<i64: 64, 128>}]} {
    %c0 = arith.constant 0 : index
    %c0_0 = arith.constant 0 : index
    %0 = vector.load %arg1[%c0, %c0_0] : memref<64x256xf32, #tpu.memory_space<vmem>>, vector<64x256xf32>
    %c0_1 = arith.constant 0 : index
    %c0_2 = arith.constant 0 : index
    %1 = vector.load %arg2[%c0_1, %c0_2] : memref<256x128xf32, #tpu.memory_space<vmem>>, vector<256x128xf32>
    %cst = arith.constant dense<0.000000e+00> : vector<64x128xf32>
    %2 = tpu.matmul %0, %1, %cst {dimension_numbers = #tpu.dot_dimension_numbers<[1], [0], [0], [1], [0, 0, 1, 1], [], []>} : vector<64x256xf32>, vector<256x128xf32>, vector<64x128xf32> -> vector<64x128xf32>
    %c0_3 = arith.constant 0 : index
    %c0_4 = arith.constant 0 : index
    %3 = vector.load %arg3[%c0_3, %c0_4] : memref<8x128xf32, #tpu.memory_space<vmem>>, vector<8x128xf32>
    %4 = vector.extract_strided_slice %3 {offsets = [0, 0], sizes = [1, 128], strides = [1, 1]} : vector<8x128xf32> to vector<1x128xf32>
    %5 = vector.broadcast %4 : vector<1x128xf32> to vector<64x128xf32>
    %6 = arith.addf %2, %5 : vector<64x128xf32>
    %cst_5 = arith.constant dense<0.000000e+00> : vector<64xf32>
    %7 = vector.multi_reduction <add>, %6, %cst_5 [1] : vector<64x128xf32> to vector<64xf32>
    %8 = vector.shape_cast %7 : vector<64xf32> to vector<64x1xf32>
    %9 = arith.mulf %6, %6 : vector<64x128xf32>
    %cst_6 = arith.constant dense<0.000000e+00> : vector<64xf32>
    %10 = vector.multi_reduction <add>, %9, %cst_6 [1] : vector<64x128xf32> to vector<64xf32>
    %11 = vector.shape_cast %10 : vector<64xf32> to vector<64x1xf32>
    %cst_7 = arith.constant 7.812500e-03 : f32
    %12 = vector.broadcast %cst_7 : f32 to vector<64x1xf32>
    %13 = arith.mulf %8, %12 : vector<64x1xf32>
    %cst_8 = arith.constant 7.812500e-03 : f32
    %14 = vector.broadcast %cst_8 : f32 to vector<64x1xf32>
    %15 = arith.mulf %11, %14 : vector<64x1xf32>
    %16 = arith.mulf %13, %13 : vector<64x1xf32>
    %17 = arith.subf %15, %16 : vector<64x1xf32>
    %cst_9 = arith.constant 0.000000e+00 : f32
    %18 = vector.broadcast %cst_9 : f32 to vector<64x1xf32>
    %19 = arith.maximumf %17, %18 : vector<64x1xf32>
    %20 = vector.broadcast %13 : vector<64x1xf32> to vector<64x128xf32>
    %21 = arith.subf %6, %20 : vector<64x128xf32>
    %cst_10 = arith.constant 9.99999974E-6 : f32
    %22 = vector.broadcast %cst_10 : f32 to vector<64x1xf32>
    %23 = arith.addf %19, %22 : vector<64x1xf32>
    %24 = math.rsqrt %23 : vector<64x1xf32>
    %25 = vector.broadcast %24 : vector<64x1xf32> to vector<64x128xf32>
    %26 = arith.mulf %21, %25 : vector<64x128xf32>
    %27 = vector.extract_strided_slice %3 {offsets = [1, 0], sizes = [1, 128], strides = [1, 1]} : vector<8x128xf32> to vector<1x128xf32>
    %28 = vector.broadcast %27 : vector<1x128xf32> to vector<64x128xf32>
    %29 = arith.mulf %26, %28 : vector<64x128xf32>
    %30 = vector.extract_strided_slice %3 {offsets = [2, 0], sizes = [1, 128], strides = [1, 1]} : vector<8x128xf32> to vector<1x128xf32>
    %31 = vector.broadcast %30 : vector<1x128xf32> to vector<64x128xf32>
    %32 = arith.addf %29, %31 : vector<64x128xf32>
    %c0_11 = arith.constant 0 : index
    %c0_12 = arith.constant 0 : index
    %33 = vector.load %arg4[%c0_11, %c0_12] : memref<64x128xf32, #tpu.memory_space<vmem>>, vector<64x128xf32>
    tpu.vector_store %arg4[%c0_11, %c0_12], %32 {strides = array<i32>} : memref<64x128xf32, #tpu.memory_space<vmem>>, vector<64x128xf32>,
    return
  }
  func.func @transform_0(%arg0: i32) -> (i32, i32) {
    %c0_i32 = arith.constant 0 : i32
    %c0_i32_0 = arith.constant 0 : i32
    return %arg0, %c0_i32 : i32, i32
  }
  func.func @transform_1(%arg0: i32) -> (i32, i32) {
    %c0_i32 = arith.constant 0 : i32
    %c0_i32_0 = arith.constant 0 : i32
    %c0_i32_1 = arith.constant 0 : i32
    return %c0_i32, %c0_i32_0 : i32, i32
  }
  func.func @transform_2(%arg0: i32) -> (i32, i32) {
    %c0_i32 = arith.constant 0 : i32
    %c0_i32_0 = arith.constant 0 : i32
    %c0_i32_1 = arith.constant 0 : i32
    return %c0_i32, %c0_i32_0 : i32, i32
  }
  func.func @transform_3(%arg0: i32) -> (i32, i32) {
    %c0_i32 = arith.constant 0 : i32
    %c0_i32_0 = arith.constant 0 : i32
    return %arg0, %c0_i32 : i32, i32
  }
}

module attributes {stable_mosaic.version = 11 : i64} {
  func.func @_proj_ln_kernel(%arg0: i32, %arg1: memref<64x256xf32, #tpu.memory_space<vmem>>, %arg2: memref<256x128xf32, #tpu.memory_space<vmem>>, %arg3: memref<8x128xf32, #tpu.memory_space<vmem>>, %arg4: memref<64x128xf32, #tpu.memory_space<vmem>>) attributes {dimension_semantics = [#tpu.dimension_semantics<parallel>], iteration_bounds = array<i64: 1>, scalar_prefetch = 0 : i64, scratch_operands = 0 : i64, tpu.core_type = #tpu.core_type<tc>, window_params = [{transform_indices = @transform_0, window_bounds = array<i64: 64, 256>}, {pipeline_mode = #tpu.pipeline_mode<synchronous>, transform_indices = @transform_1, window_bounds = array<i64: 256, 128>}, {pipeline_mode = #tpu.pipeline_mode<synchronous>, transform_indices = @transform_2, window_bounds = array<i64: 8, 128>}, {transform_indices = @transform_3, window_bounds = array<i64: 64, 128>}]} {
    %c0 = arith.constant 0 : index
    %c0_0 = arith.constant 0 : index
    %0 = vector.load %arg1[%c0, %c0_0] : memref<64x256xf32, #tpu.memory_space<vmem>>, vector<64x256xf32>
    %c0_1 = arith.constant 0 : index
    %c0_2 = arith.constant 0 : index
    %1 = vector.load %arg2[%c0_1, %c0_2] : memref<256x128xf32, #tpu.memory_space<vmem>>, vector<256x128xf32>
    %cst = arith.constant dense<0.000000e+00> : vector<64x128xf32>
    %2 = tpu.matmul %0, %1, %cst {dimension_numbers = #tpu.dot_dimension_numbers<[1], [0], [0], [1], [0, 0, 1, 1], [], []>} : vector<64x256xf32>, vector<256x128xf32>, vector<64x128xf32> -> vector<64x128xf32>
    %c0_3 = arith.constant 0 : index
    %c0_4 = arith.constant 0 : index
    %3 = vector.load %arg3[%c0_3, %c0_4] : memref<8x128xf32, #tpu.memory_space<vmem>>, vector<8x128xf32>
    %4 = vector.extract_strided_slice %3 {offsets = [0, 0], sizes = [1, 128], strides = [1, 1]} : vector<8x128xf32> to vector<1x128xf32>
    %5 = vector.broadcast %4 : vector<1x128xf32> to vector<64x128xf32>
    %6 = arith.addf %2, %5 : vector<64x128xf32>
    %cst_5 = arith.constant dense<0.000000e+00> : vector<64xf32>
    %7 = vector.multi_reduction <add>, %6, %cst_5 [1] : vector<64x128xf32> to vector<64xf32>
    %8 = vector.shape_cast %7 : vector<64xf32> to vector<64x1xf32>
    %9 = arith.mulf %6, %6 : vector<64x128xf32>
    %cst_6 = arith.constant dense<0.000000e+00> : vector<64xf32>
    %10 = vector.multi_reduction <add>, %9, %cst_6 [1] : vector<64x128xf32> to vector<64xf32>
    %11 = vector.shape_cast %10 : vector<64xf32> to vector<64x1xf32>
    %cst_7 = arith.constant 7.812500e-03 : f32
    %12 = vector.broadcast %cst_7 : f32 to vector<64x1xf32>
    %13 = arith.mulf %8, %12 : vector<64x1xf32>
    %cst_8 = arith.constant 7.812500e-03 : f32
    %14 = vector.broadcast %cst_8 : f32 to vector<64x1xf32>
    %15 = arith.mulf %11, %14 : vector<64x1xf32>
    %16 = arith.mulf %13, %13 : vector<64x1xf32>
    %17 = arith.subf %15, %16 : vector<64x1xf32>
    %cst_9 = arith.constant 0.000000e+00 : f32
    %18 = vector.broadcast %cst_9 : f32 to vector<64x1xf32>
    %19 = arith.maximumf %17, %18 : vector<64x1xf32>
    %20 = vector.broadcast %13 : vector<64x1xf32> to vector<64x128xf32>
    %21 = arith.subf %6, %20 : vector<64x128xf32>
    %cst_10 = arith.constant 9.99999974E-6 : f32
    %22 = vector.broadcast %cst_10 : f32 to vector<64x1xf32>
    %23 = arith.addf %19, %22 : vector<64x1xf32>
    %24 = math.rsqrt %23 : vector<64x1xf32>
    %25 = vector.broadcast %24 : vector<64x1xf32> to vector<64x128xf32>
    %26 = arith.mulf %21, %25 : vector<64x128xf32>
    %27 = vector.extract_strided_slice %3 {offsets = [1, 0], sizes = [1, 128], strides = [1, 1]} : vector<8x128xf32> to vector<1x128xf32>
    %28 = vector.broadcast %27 : vector<1x128xf32> to vector<64x128xf32>
    %29 = arith.mulf %26, %28 : vector<64x128xf32>
    %30 = vector.extract_strided_slice %3 {offsets = [2, 0], sizes = [1, 128], strides = [1, 1]} : vector<8x128xf32> to vector<1x128xf32>
    %31 = vector.broadcast %30 : vector<1x128xf32> to vector<64x128xf32>
    %32 = arith.addf %29, %31 : vector<64x128xf32>
    %c0_11 = arith.constant 0 : index
    %c0_12 = arith.constant 0 : index
    %33 = vector.load %arg4[%c0_11, %c0_12] : memref<64x128xf32, #tpu.memory_space<vmem>>, vector<64x128xf32>
    tpu.vector_store %arg4[%c0_11, %c0_12], %32 {strides = array<i32>} : memref<64x128xf32, #tpu.memory_space<vmem>>, vector<64x128xf32>,
    return
  }
  func.func @transform_0(%arg0: i32) -> (i32, i32) {
    %c0_i32 = arith.constant 0 : i32
    %c0_i32_0 = arith.constant 0 : i32
    return %arg0, %c0_i32 : i32, i32
  }
  func.func @transform_1(%arg0: i32) -> (i32, i32) {
    %c0_i32 = arith.constant 0 : i32
    %c0_i32_0 = arith.constant 0 : i32
    %c0_i32_1 = arith.constant 0 : i32
    return %c0_i32, %c0_i32_0 : i32, i32
  }
  func.func @transform_2(%arg0: i32) -> (i32, i32) {
    %c0_i32 = arith.constant 0 : i32
    %c0_i32_0 = arith.constant 0 : i32
    %c0_i32_1 = arith.constant 0 : i32
    return %c0_i32, %c0_i32_0 : i32, i32
  }
  func.func @transform_3(%arg0: i32) -> (i32, i32) {
    %c0_i32 = arith.constant 0 : i32
    %c0_i32_0 = arith.constant 0 : i32
    return %arg0, %c0_i32 : i32, i32
  }
}

</mosaic_0001>

<bundles_post_ra>
// kernel: tpu_custom_call.1
= control target key start
LH: loop header
LB: loop body
LE: loop exit
PB: predicated region body
PF: predicated region fallthrough
CT: control target
= control target key end

     0   :  { %8 = vsyncpa [#allocation3], 0  ;;  %s753_s0 = inlined_call_operand.hbm [shape: f32[64,256], index: 0, kind: input, shape index: {}]   ;;  %s754_s1 = inlined_call_operand.hbm [shape: f32[256,128], index: 1, kind: input, shape index: {}]   ;;  %s755_s2 = inlined_call_operand.hbm [shape: f32[8,128], index: 2, kind: input, shape index: {}]   ;;  %s756_s3 = inlined_call_operand.hbm [shape: f32[64,128], index: 3, kind: output, shape index: {}]  }
   0x1   :  { %9 = vsyncpa [#allocation6], 0  ;;  %s28_s14 = sshll.u32 %s754_s1, 4  ;;  %s29_s14 = int_to_ptr.hbm [resolvable:$true] %s28_s14 }
   0x2   :  { %10 = vsyncpa [#allocation4], 0  ;;  %s580_s15 = smov [#allocation5]   ;;  %s15_s19 = sshll.u32 %s753_s0, 4  ;;  %s16_s19 = int_to_ptr.hbm [resolvable:$true] %s15_s19 }
   0x3   :  { %s30_s16 = sshll.u32 %s580_s15, 4  ;;  %s581_s20 = smov 128   ;;  %s31_s16 = int_to_ptr.vmem [resolvable:$true] %s30_s16 }
   0x4   :  { %s582_s21 = smov 8   ;;  %s583_s22 = smov [#allocation2]  }
   0x5   :  { %36 = dma.hbm_to_vmem [thread:$0]  %s29_s14, 4096, %s31_s16, [#allocation6], %s581_s20, %s581_s20, %s582_s21  }
   0x6   :  { %s17_s23 = sshll.u32 %s583_s22, 4  ;;  %s584_s1 = smov 256   ;;  %s18_s23 = int_to_ptr.vmem [resolvable:$true] %s17_s23 }
   0x7   :  { %s585_s24 = smov 16   ;;  %s42_s27 = sshll.u32 %s755_s2, 4  ;;  %s43_s27 = int_to_ptr.hbm [resolvable:$true] %s42_s27 }
   0x8   :  { %23 = dma.hbm_to_vmem [thread:$0]  %s16_s19, 2048, %s18_s23, [#allocation3], %s584_s1, %s584_s1, %s585_s24  }
   0x9   :  { %s586_s28 = smov [#allocation7]  }
   0xa   :  { %s44_s0 = sshll.u32 %s586_s28, 4  ;;  %s45_s0 = int_to_ptr.vmem [resolvable:$true] %s44_s0 }
   0xb   :  { %47 = dma.hbm_to_vmem [thread:$0]  %s43_s27, 128, %s45_s0, [#allocation6]  }
   0xc   :  { %574 = dma.done.wait [#allocation3], 2048  }
   0xd   :  { %575 = vsyncadd [#allocation3], 4294965248 }
   0xe   :  { %576 = dma.done.wait [#allocation6], 4224  }
   0xf   :  { %577 = vsyncadd [#allocation6], 4294963072  ;;  %v91_v0 = vld [vmem:[#allocation5 + $0x78] sm:$0xff]  ;;  %v90_v1 = vld [vmem:[#allocation5 + $0x70] sm:$0xff]  ;;  %s587_s2 = smov [#allocation8]   ;;  %s408_s5 = sshll.u32 %s756_s3, 4  ;;  %s409_s5 = int_to_ptr.hbm [resolvable:$true] %s408_s5 }
  0x10   :  { %v107_v2 = vld [vmem:[#allocation5 + $0xf8] sm:$0xff]  ;;  %110 = vmatpush.msra.mxu0 %v91_v0  ;;  %v106_v3 = vld [vmem:[#allocation5 + $0xf0] sm:$0xff]  ;;  %422 = vmatpush.msra.mxu2 %v91_v0  ;;  %v89_v4 = vld [vmem:[#allocation5 + $0x68] sm:$0xff]  ;;  %s406_s29 = sshll.u32 %s587_s2, 4  ;;  %s407_s29 = int_to_ptr.vmem [resolvable:$true] %s406_s29 }
  0x11   :  { %151 = vmatpush.msra.mxu1 %v107_v2  ;;  %438 = vmatpush.msra.mxu3 %v107_v2  ;;  %v105_v5 = vld [vmem:[#allocation5 + $0xe8] sm:$0xff]  ;;  %v88_v6 = vld [vmem:[#allocation5 + $0x60] sm:$0xff]  ;;  %v87_v8 = vld [vmem:[#allocation5 + $0x58] sm:$0xff] }
  0x12   :  { %111 = vmatpush.msra.mxu0 %v90_v1  ;;  %423 = vmatpush.msra.mxu2 %v90_v1  ;;  %v104_v7 = vld [vmem:[#allocation5 + $0xe0] sm:$0xff]  ;;  %v103_v9 = vld [vmem:[#allocation5 + $0xd8] sm:$0xff]  ;;  %v86_v10 = vld [vmem:[#allocation5 + $0x50] sm:$0xff] }
  0x13   :  { %152 = vmatpush.msra.mxu1 %v106_v3  ;;  %439 = vmatpush.msra.mxu3 %v106_v3  ;;  %v102_v11 = vld [vmem:[#allocation5 + $0xd0] sm:$0xff]  ;;  %v85_v12 = vld [vmem:[#allocation5 + $0x48] sm:$0xff]  ;;  %v84_v14 = vld [vmem:[#allocation5 + $0x40] sm:$0xff] }
  0x14   :  { %112 = vmatpush.msra.mxu0 %v89_v4  ;;  %424 = vmatpush.msra.mxu2 %v89_v4  ;;  %v101_v13 = vld [vmem:[#allocation5 + $0xc8] sm:$0xff]  ;;  %v100_v15 = vld [vmem:[#allocation5 + $0xc0] sm:$0xff]  ;;  %v83_v16 = vld [vmem:[#allocation5 + $0x38] sm:$0xff] }
  0x15   :  { %153 = vmatpush.msra.mxu1 %v105_v5  ;;  %440 = vmatpush.msra.mxu3 %v105_v5  ;;  %v99_v17 = vld [vmem:[#allocation5 + $0xb8] sm:$0xff]  ;;  %v82_v18 = vld [vmem:[#allocation5 + $0x30] sm:$0xff]  ;;  %v81_v20 = vld [vmem:[#allocation5 + $0x28] sm:$0xff] }
  0x16   :  { %113 = vmatpush.msra.mxu0 %v88_v6  ;;  %425 = vmatpush.msra.mxu2 %v88_v6  ;;  %v98_v19 = vld [vmem:[#allocation5 + $0xb0] sm:$0xff]  ;;  %v97_v21 = vld [vmem:[#allocation5 + $0xa8] sm:$0xff]  ;;  %v80_v22 = vld [vmem:[#allocation5 + $0x20] sm:$0xff] }
  0x17   :  { %154 = vmatpush.msra.mxu1 %v104_v7  ;;  %441 = vmatpush.msra.mxu3 %v104_v7  ;;  %v96_v23 = vld [vmem:[#allocation5 + $0xa0] sm:$0xff]  ;;  %v79_v24 = vld [vmem:[#allocation5 + $0x18] sm:$0xff]  ;;  %v78_v26 = vld [vmem:[#allocation5 + $0x10] sm:$0xff] }
  0x18   :  { %114 = vmatpush.msra.mxu0 %v87_v8  ;;  %426 = vmatpush.msra.mxu2 %v87_v8  ;;  %v95_v25 = vld [vmem:[#allocation5 + $0x98] sm:$0xff]  ;;  %v94_v27 = vld [vmem:[#allocation5 + $0x90] sm:$0xff]  ;;  %v77_v28 = vld [vmem:[#allocation5 + $0x8] sm:$0xff] }
  0x19   :  { %155 = vmatpush.msra.mxu1 %v103_v9  ;;  %442 = vmatpush.msra.mxu3 %v103_v9  ;;  %v93_v29 = vld [vmem:[#allocation5 + $0x88] sm:$0xff]  ;;  %v76_v30 = vld [vmem:[#allocation5] sm:$0xff]  ;;  %v62_v36 = vld [vmem:[#allocation2 + $0x10] sm:$0xff] }
  0x1a   :  { %115 = vmatpush.msra.mxu0 %v86_v10  ;;  %427 = vmatpush.msra.mxu2 %v86_v10  ;;  %v92_v31 = vld [vmem:[#allocation5 + $0x80] sm:$0xff]  ;;  %v61_v33 = vld [vmem:[#allocation2 + $0x8] sm:$0xff]  ;;  %v63_v37 = vld [vmem:[#allocation2 + $0x18] sm:$0xff] }
  0x1b   :  { %156 = vmatpush.msra.mxu1 %v102_v11  ;;  %443 = vmatpush.msra.mxu3 %v102_v11  ;;  %v60_v32 = vld [vmem:[#allocation2] sm:$0xff]  ;;  %v69_v35 = vld [vmem:[#allocation2 + $0x48] sm:$0xff]  ;;  %v70_v38 = vld [vmem:[#allocation2 + $0x50] sm:$0xff] }
  0x1c   :  { %116 = vmatpush.msra.mxu0 %v85_v12  ;;  %428 = vmatpush.msra.mxu2 %v85_v12  ;;  %v68_v34 = vld [vmem:[#allocation2 + $0x40] sm:$0xff]  ;;  %v71_v39 = vld [vmem:[#allocation2 + $0x58] sm:$0xff]  ;;  %v65_v41 = vld [vmem:[#allocation2 + $0x28] sm:$0xff] }
  0x1d   :  { %157 = vmatpush.msra.mxu1 %v101_v13  ;;  %444 = vmatpush.msra.mxu3 %v101_v13  ;;  %v64_v40 = vld [vmem:[#allocation2 + $0x20] sm:$0xff]  ;;  %v73_v43 = vld [vmem:[#allocation2 + $0x68] sm:$0xff]  ;;  %v66_v44 = vld [vmem:[#allocation2 + $0x30] sm:$0xff] }
  0x1e   :  { %117 = vmatpush.msra.mxu0 %v84_v14  ;;  %429 = vmatpush.msra.mxu2 %v84_v14  ;;  %v72_v42 = vld [vmem:[#allocation2 + $0x60] sm:$0xff]  ;;  %v67_v45 = vld [vmem:[#allocation2 + $0x38] sm:$0xff]  ;;  %v74_v46 = vld [vmem:[#allocation2 + $0x70] sm:$0xff] }
  0x1f   :  { %158 = vmatpush.msra.mxu1 %v100_v15  ;;  %445 = vmatpush.msra.mxu3 %v100_v15  ;;  %v75_v47 = vld [vmem:[#allocation2 + $0x78] sm:$0xff]  ;;  %v620_v48 = vld [vmem:[#allocation7] sm:$0xff] }
  0x20   :  { %118 = vmatpush.msra.mxu0 %v83_v16  ;;  %430 = vmatpush.msra.mxu2 %v83_v16  ;;  %v109_v49 = vperm.slane %v620_v48, 0 }
  0x21   :  { %159 = vmatpush.msra.mxu1 %v99_v17  ;;  %446 = vmatpush.msra.mxu3 %v99_v17 }
  0x22   :  { %119 = vmatpush.msra.mxu0 %v82_v18  ;;  %431 = vmatpush.msra.mxu2 %v82_v18 }
  0x23   :  { %160 = vmatpush.msra.mxu1 %v98_v19  ;;  %447 = vmatpush.msra.mxu3 %v98_v19 }
  0x24   :  { %120 = vmatpush.msra.mxu0 %v81_v20  ;;  %432 = vmatpush.msra.mxu2 %v81_v20 }
  0x25   :  { %161 = vmatpush.msra.mxu1 %v97_v21  ;;  %448 = vmatpush.msra.mxu3 %v97_v21 }
  0x26   :  { %121 = vmatpush.msra.mxu0 %v80_v22  ;;  %433 = vmatpush.msra.mxu2 %v80_v22 }
  0x27   :  { %162 = vmatpush.msra.mxu1 %v96_v23  ;;  %449 = vmatpush.msra.mxu3 %v96_v23 }
  0x28   :  { %122 = vmatpush.msra.mxu0 %v79_v24  ;;  %434 = vmatpush.msra.mxu2 %v79_v24 }
  0x29   :  { %163 = vmatpush.msra.mxu1 %v95_v25  ;;  %450 = vmatpush.msra.mxu3 %v95_v25 }
  0x2a   :  { %123 = vmatpush.msra.mxu0 %v78_v26  ;;  %435 = vmatpush.msra.mxu2 %v78_v26 }
  0x2b   :  { %164 = vmatpush.msra.mxu1 %v94_v27  ;;  %451 = vmatpush.msra.mxu3 %v94_v27 }
  0x2c   :  { %124 = vmatpush.msra.mxu0 %v77_v28  ;;  %436 = vmatpush.msra.mxu2 %v77_v28 }
  0x2d   :  { %165 = vmatpush.msra.mxu1 %v93_v29  ;;  %452 = vmatpush.msra.mxu3 %v93_v29 }
  0x2e   :  { %125 = vmatpush.msra.mxu0 %v76_v30  ;;  %437 = vmatpush.msra.mxu2 %v76_v30 }
  0x2f   :  { %166 = vmatpush.msra.mxu1 %v92_v31  ;;  %126 = vmatmul.f32.vlgmr.msra.gmra.mxu0 %v60_v32 }
  0x30   :  { %167 = vmatmul.f32.vlgmr.msra.gmra.mxu1 %v61_v33  ;;  %453 = vmatpush.msra.mxu3 %v92_v31 }
  0x31   :  { %138 = vmatmul.f32.vlgmr.msra.gmra.mxu2 %v68_v34  ;;  %179 = vmatmul.f32.vlgmr.msra.gmra.mxu3 %v69_v35 }
  0x37   :  { %129 = vmatmul.f32.gmra.mxu0 %v62_v36 }
  0x38   :  { %170 = vmatmul.f32.gmra.mxu1 %v63_v37 }
  0x39   :  { %141 = vmatmul.f32.gmra.mxu2 %v70_v38  ;;  %182 = vmatmul.f32.gmra.mxu3 %v71_v39 }
  0x3f   :  { %132 = vmatmul.f32.gmra.mxu0 %v64_v40 }
  0x40   :  { %173 = vmatmul.f32.gmra.mxu1 %v65_v41 }
  0x41   :  { %144 = vmatmul.f32.gmra.mxu2 %v72_v42  ;;  %185 = vmatmul.f32.gmra.mxu3 %v73_v43 }
  0x47   :  { %135 = vmatmul.f32.gmra.mxu0 %v66_v44 }
  0x48   :  { %176 = vmatmul.f32.gmra.mxu1 %v67_v45 }
  0x49   :  { %147 = vmatmul.f32.gmra.mxu2 %v74_v46  ;;  %188 = vmatmul.f32.gmra.mxu3 %v75_v47 }
  0xac   :  { %v127_v50 = vpop.f32.mrf.mxu0 }
  0xad   :  { %v168_v51 = vpop.f32.mrf.mxu1  ;;  %v128_v52 = vadd.f32 %v127_v50, %v109_v49 }
  0xaf   :  { %v623_v53 = vadd.f32 %v168_v51, %v128_v52 }
  0xb1   :  { %192 = vadd.xlane.f32.xlu0 %v623_v53  ;;  %v208_v54 = vmul.f32 %v623_v53, %v623_v53 }
  0xb3   :  { %216 = vadd.xlane.f32.xlu2 %v208_v54 }
  0xb4   :  { %v130_v55 = vpop.f32.mrf.mxu0  ;;  %v139_v56 = vpop.f32.mrf.mxu2 }
  0xb5   :  { %v131_v57 = vadd.f32 %v130_v55, %v109_v49  ;;  %v140_v58 = vadd.f32 %v139_v56, %v109_v49  ;;  %v171_v59 = vpop.f32.mrf.mxu1  ;;  %v180_v60 = vpop.f32.mrf.mxu3 }
  0xb7   :  { %v628_v61 = vadd.f32 %v171_v59, %v131_v57  ;;  %v630_v62 = vadd.f32 %v180_v60, %v140_v58 }
  0xb9   :  { %194 = vadd.xlane.f32.xlu0 %v628_v61  ;;  %v212_v5 = vmul.f32 %v630_v62, %v630_v62  ;;  %v209_v15 = vmul.f32 %v628_v61, %v628_v61 }
  0xbb   :  { %200 = vadd.xlane.f32.xlu2 %v630_v62 }
  0xbc   :  { %v133_v63 = vpop.f32.mrf.mxu0  ;;  %v142_v0 = vpop.f32.mrf.mxu2 }
  0xbd   :  { %v134_v1 = vadd.f32 %v133_v63, %v109_v49  ;;  %v143_v2 = vadd.f32 %v142_v0, %v109_v49  ;;  %v174_v3 = vpop.f32.mrf.mxu1  ;;  %v183_v4 = vpop.f32.mrf.mxu3  ;;  %v678_v0 = vperm.slane %v620_v48, 1 }
  0xbf   :  { %v636_v6 = vadd.f32 %v174_v3, %v134_v1  ;;  %v638_v7 = vadd.f32 %v183_v4, %v143_v2 }
  0xc1   :  { %196 = vadd.xlane.f32.xlu1 %v636_v6  ;;  %224 = vadd.xlane.f32.xlu0 %v212_v5  ;;  %v210_v14 = vmul.f32 %v636_v6, %v636_v6  ;;  %v213_v25 = vmul.f32 %v638_v7, %v638_v7  ;;  %v682_v5 = vperm.slane %v620_v48, 2 }
  0xc3   :  { %202 = vadd.xlane.f32.xlu2 %v638_v7 }
  0xc4   :  { %v136_v8 = vpop.f32.mrf.mxu0  ;;  %v145_v9 = vpop.f32.mrf.mxu2 }
  0xc5   :  { %v137_v10 = vadd.f32 %v136_v8, %v109_v49  ;;  %v177_v11 = vpop.f32.mrf.mxu1  ;;  %v186_v12 = vpop.f32.mrf.mxu3  ;;  %v146_v16 = vadd.f32 %v145_v9, %v109_v49 }
  0xc7   :  { %v642_v13 = vadd.f32 %v177_v11, %v137_v10  ;;  %v650_v18 = vadd.f32 %v186_v12, %v146_v16 }
  0xc9   :  { %220 = vadd.xlane.f32.xlu1 %v210_v14  ;;  %218 = vadd.xlane.f32.xlu0 %v209_v15  ;;  %v211_v17 = vmul.f32 %v642_v13, %v642_v13  ;;  %v214_v22 = vmul.f32 %v650_v18, %v650_v18 }
  0xcb   :  { %222 = vadd.xlane.f32.xlu2 %v211_v17 }
  0xcc   :  { %v148_v19 = vpop.f32.mrf.mxu2 }
  0xcd   :  { %v149_v20 = vadd.f32 %v148_v19, %v109_v49  ;;  %v189_v21 = vpop.f32.mrf.mxu3 }
  0xcf   :  { %v656_v23 = vadd.f32 %v189_v21, %v149_v20 }
  0xd1   :  { %198 = vadd.xlane.f32.xlu1 %v642_v13  ;;  %204 = vadd.xlane.f32.xlu0 %v650_v18  ;;  %v215_v24 = vmul.f32 %v656_v23, %v656_v23 }
  0xd3   :  { %228 = vadd.xlane.f32.xlu2 %v214_v22 }
  0xd9   :  { %206 = vadd.xlane.f32.xlu1 %v656_v23  ;;  %230 = vadd.xlane.f32.xlu0 %v215_v24 }
  0xe1   :  { %226 = vadd.xlane.f32.xlu1 %v213_v25 }
 0x124   :  { %v193_v26 = vpop.xlane.xlu0 %192 }
 0x125   :  { %v232_v27 = vmul.f32 0.0078125, %v193_v26 }
 0x126   :  { %v217_v28 = vpop.xlane.xlu2 %216 }
 0x127   :  { %v248_v29 = vmul.f32 %v232_v27, %v232_v27  ;;  %v240_v30 = vmul.f32 0.0078125, %v217_v28  ;;  %v272_v1 = vsub.f32 %v623_v53, %v232_v27 }
 0x129   :  { %v256_v31 = vsub.f32 %v240_v30, %v248_v29 }
 0x12b   :  { %v264_v32 = vmax.f32 %v256_v31, 0.0 }
 0x12c   :  { %v195_v33 = vpop.xlane.xlu0 %194 }
 0x12d   :  { %v280_v34 = vadd.f32 1e-05, %v264_v32  ;;  %v669_v46 = vmul.f32 0.0078125, %v195_v33 }
 0x12e   :  { %v201_v35 = vpop.xlane.xlu2 %200 }
 0x12f   :  { %462 = vrsqrt.f32 %v280_v34  ;;  %v663_v36 = vmul.f32 0.0078125, %v201_v35  ;;  %v249_v54 = vmul.f32 %v669_v46, %v669_v46  ;;  %vm294_vm1 = vweird.f32 %v280_v34 }
 0x131   :  { %v252_v37 = vmul.f32 %v663_v36, %v663_v36 }
 0x134   :  { %v197_v38 = vpop.xlane.xlu1 %196  ;;  %v225_v39 = vpop.xlane.xlu0 %224 }
 0x135   :  { %v463_v40 = vpop.eup %462  ;;  %v244_v41 = vmul.f32 0.0078125, %v225_v39  ;;  %v671_v47 = vmul.f32 0.0078125, %v197_v38 }
 0x136   :  { %v289_v42 = vmul.f32 %v463_v40, %v280_v34  ;;  %v667_v43 = vpop.xlane.xlu2 %202  ;;  %vm295_vm0 = vweird.f32 %v463_v40 }
 0x137   :  { %v260_v44 = vsub.f32 %v244_v41, %v252_v37  ;;  %v250_v57 = vmul.f32 %v671_v47, %v671_v47  ;;  %vm296_vm2 = vmor %vm294_vm1, %vm295_vm0 }
 0x138   :  { %v290_v45 = vmul.f32 %v463_v40, %v289_v42 }
 0x139   :  { %v268_v49 = vmax.f32 %v260_v44, 0.0 }
 0x13a   :  { %v291_v50 = vmul.f32 0.5, %v290_v45 }
 0x13b   :  { %v284_v51 = vadd.f32 1e-05, %v268_v49 }
 0x13c   :  { %v292_v52 = vsub.f32 1.5, %v291_v50  ;;  %v221_v55 = vpop.xlane.xlu1 %220  ;;  %v219_v56 = vpop.xlane.xlu0 %218 }
 0x13d   :  { %464 = vrsqrt.f32 %v284_v51  ;;  %v242_v58 = vmul.f32 0.0078125, %v221_v55  ;;  %v241_v59 = vmul.f32 0.0078125, %v219_v56  ;;  %vm334_vm4 = vweird.f32 %v284_v51 }
 0x13e   :  { %v293_v60 = vmul.f32 %v463_v40, %v292_v52  ;;  %v223_v63 = vpop.xlane.xlu2 %222 }
 0x13f   :  { %v258_v2 = vsub.f32 %v242_v58, %v250_v57  ;;  %v257_v3 = vsub.f32 %v241_v59, %v249_v54  ;;  %v243_v20 = vmul.f32 0.0078125, %v223_v63 }
 0x140   :  { %v297_v4 = vsel %vm296_vm2, %v463_v40, %v293_v60  ;;  %v276_v40 = vsub.f32 %v630_v62, %v663_v36 }
 0x141   :  { %v368_v8 = vmul.f32 %v297_v4, %v272_v1  ;;  %v266_v9 = vmax.f32 %v258_v2, 0.0  ;;  %v265_v10 = vmax.f32 %v257_v3, 0.0  ;;  %v274_v1 = vsub.f32 %v636_v6, %v671_v47 }
 0x143   :  { %v465_v11 = vpop.eup %464  ;;  %v377_v12 = vmul.f32 %v678_v0, %v368_v8  ;;  %v282_v14 = vadd.f32 1e-05, %v266_v9  ;;  %v685_v15 = vadd.f32 1e-05, %v265_v10  ;;  %v715_v8 = vmul.f32 0.0078125, %v667_v43 }
 0x144   :  { %v329_v16 = vmul.f32 %v465_v11, %v284_v51  ;;  %v199_v17 = vpop.xlane.xlu1 %198  ;;  %v205_v19 = vpop.xlane.xlu0 %204  ;;  %vm335_vm3 = vweird.f32 %v465_v11 }
 0x145   :  { %v386_v53 = vadd.f32 %v682_v5, %v377_v12  ;;  %466 = vrsqrt.f32 %v282_v14  ;;  %v689_v48 = vmul.f32 0.0078125, %v199_v17  ;;  %v691_v22 = vmul.f32 0.0078125, %v205_v19  ;;  %vm336_vm5 = vmor %vm334_vm4, %vm335_vm3 }
 0x146   :  { %v330_v21 = vmul.f32 %v465_v11, %v329_v16  ;;  %468 = vrsqrt.f32 %v685_v15  ;;  %v229_v24 = vpop.xlane.xlu2 %228  ;;  %vm314_vm8 = vweird.f32 %v282_v14  ;;  %vm304_vm10 = vweird.f32 %v685_v15 }
 0x147   :  { %394 = vst [vmem:[#allocation8] sm:$0xff] %v386_v53  ;;  %v246_v25 = vmul.f32 0.0078125, %v229_v24  ;;  %v251_v27 = vmul.f32 %v689_v48, %v689_v48  ;;  %v254_v28 = vmul.f32 %v691_v22, %v691_v22  ;;  %v273_v12 = vsub.f32 %v628_v61, %v669_v46 }
 0x148   :  { %v331_v26 = vmul.f32 0.5, %v330_v21 }
 0x149   :  { %v259_v30 = vsub.f32 %v243_v20, %v251_v27  ;;  %v262_v31 = vsub.f32 %v246_v25, %v254_v28 }
 0x14a   :  { %v332_v29 = vsub.f32 1.5, %v331_v26 }
 0x14b   :  { %v467_v32 = vpop.eup %466  ;;  %v267_v37 = vmax.f32 %v259_v30, 0.0  ;;  %v270_v42 = vmax.f32 %v262_v31, 0.0 }
 0x14c   :  { %v469_v33 = vpop.eup %468  ;;  %v333_v34 = vmul.f32 %v465_v11, %v332_v29  ;;  %v309_v35 = vmul.f32 %v467_v32, %v282_v14  ;;  %v207_v38 = vpop.xlane.xlu1 %206  ;;  %vm315_vm6 = vweird.f32 %v467_v32  ;;  %v253_v14 = vmul.f32 %v715_v8, %v715_v8 }
 0x14d   :  { %v231_v39 = vpop.xlane.xlu0 %230  ;;  %v299_v41 = vmul.f32 %v469_v33, %v685_v15  ;;  %v700_v44 = vmul.f32 0.0078125, %v207_v38  ;;  %v702_v50 = vadd.f32 1e-05, %v267_v37  ;;  %v704_v55 = vadd.f32 1e-05, %v270_v42  ;;  %vm316_vm9 = vmor %vm314_vm8, %vm315_vm6 }
 0x14e   :  { %v337_v45 = vsel %vm336_vm5, %v465_v11, %v333_v34  ;;  %v310_v49 = vmul.f32 %v467_v32, %v309_v35  ;;  %v247_v52 = vmul.f32 0.0078125, %v231_v39  ;;  %vm305_vm7 = vweird.f32 %v469_v33 }
 0x14f   :  { %v372_v54 = vmul.f32 %v337_v45, %v276_v40  ;;  %v300_v51 = vmul.f32 %v469_v33, %v299_v41  ;;  %v255_v56 = vmul.f32 %v700_v44, %v700_v44  ;;  %470 = vrsqrt.f32 %v702_v50  ;;  %vm306_vm11 = vmor %vm304_vm10, %vm305_vm7 }
 0x150   :  { %v311_v57 = vmul.f32 0.5, %v310_v49  ;;  %472 = vrsqrt.f32 %v704_v55  ;;  %vm324_vm14 = vweird.f32 %v702_v50  ;;  %v275_v37 = vsub.f32 %v642_v13, %v689_v48 }
 0x151   :  { %v381_v62 = vmul.f32 %v678_v0, %v372_v54  ;;  %v301_v36 = vmul.f32 0.5, %v300_v51  ;;  %v263_v59 = vsub.f32 %v247_v52, %v255_v56  ;;  %vm354_vm0 = vweird.f32 %v704_v55 }
 0x152   :  { %v312_v58 = vsub.f32 1.5, %v311_v57  ;;  %v278_v40 = vsub.f32 %v650_v18, %v691_v22  ;;  %v279_v18 = vsub.f32 %v656_v23, %v700_v44 }
 0x153   :  { %v390_v60 = vadd.f32 %v682_v5, %v381_v62  ;;  %v302_v63 = vsub.f32 1.5, %v301_v36  ;;  %v271_v3 = vmax.f32 %v263_v59, 0.0 }
 0x154   :  { %v313_v2 = vmul.f32 %v467_v32, %v312_v58  ;;  %v227_v4 = vpop.xlane.xlu1 %226 }
 0x155   :  { %398 = vst [vmem:[#allocation8 + $0x20] sm:$0xff] %v390_v60  ;;  %v303_v9 = vmul.f32 %v469_v33, %v302_v63  ;;  %v245_v10 = vmul.f32 0.0078125, %v227_v4  ;;  %v471_v11 = vpop.eup %470  ;;  %v287_v6 = vadd.f32 1e-05, %v271_v3 }
 0x156   :  { %v317_v16 = vsel %vm316_vm9, %v467_v32, %v313_v2  ;;  %v473_v47 = vpop.eup %472  ;;  %v319_v19 = vmul.f32 %v471_v11, %v702_v50  ;;  %vm325_vm12 = vweird.f32 %v471_v11  ;;  %v277_v2 = vsub.f32 %v638_v7, %v715_v8 }
 0x157   :  { %v370_v17 = vmul.f32 %v317_v16, %v274_v1  ;;  %v307_v43 = vsel %vm306_vm11, %v469_v33, %v303_v9  ;;  %v349_v15 = vmul.f32 %v473_v47, %v704_v55  ;;  %474 = vrsqrt.f32 %v287_v6  ;;  %vm326_vm15 = vmor %vm324_vm14, %vm325_vm12 }
 0x158   :  { %v369_v53 = vmul.f32 %v307_v43, %v273_v12  ;;  %v320_v21 = vmul.f32 %v471_v11, %v319_v19  ;;  %v261_v61 = vsub.f32 %v245_v10, %v253_v14  ;;  %vm355_vm13 = vweird.f32 %v473_v47 }
 0x159   :  { %v379_v20 = vmul.f32 %v678_v0, %v370_v17  ;;  %v350_v24 = vmul.f32 %v473_v47, %v349_v15  ;;  %vm356_vm1 = vmor %vm354_vm0, %vm355_vm13  ;;  %vm364_vm3 = vweird.f32 %v287_v6 }
 0x15a   :  { %v378_v46 = vmul.f32 %v678_v0, %v369_v53  ;;  %v321_v26 = vmul.f32 0.5, %v320_v21  ;;  %v269_v27 = vmax.f32 %v261_v61, 0.0 }
 0x15b   :  { %v388_v25 = vadd.f32 %v682_v5, %v379_v20  ;;  %v351_v29 = vmul.f32 0.5, %v350_v24 }
 0x15c   :  { %v387_v28 = vadd.f32 %v682_v5, %v378_v46  ;;  %v322_v30 = vsub.f32 1.5, %v321_v26  ;;  %v285_v31 = vadd.f32 1e-05, %v269_v27 }
 0x15d   :  { %396 = vst [vmem:[#allocation8 + $0x10] sm:$0xff] %v388_v25  ;;  %v475_v32 = vpop.eup %474  ;;  %v352_v33 = vsub.f32 1.5, %v351_v29 }
 0x15e   :  { %395 = vst [vmem:[#allocation8 + $0x8] sm:$0xff] %v387_v28  ;;  %v323_v34 = vmul.f32 %v471_v11, %v322_v30  ;;  %v359_v35 = vmul.f32 %v475_v32, %v287_v6  ;;  %476 = vrsqrt.f32 %v285_v31  ;;  %vm365_vm2 = vweird.f32 %v475_v32 }
 0x15f   :  { %v353_v38 = vmul.f32 %v473_v47, %v352_v33  ;;  %vm366_vm4 = vmor %vm364_vm3, %vm365_vm2  ;;  %vm344_vm6 = vweird.f32 %v285_v31 }
 0x160   :  { %v327_v39 = vsel %vm326_vm15, %v471_v11, %v323_v34  ;;  %v360_v41 = vmul.f32 %v475_v32, %v359_v35 }
 0x161   :  { %v371_v42 = vmul.f32 %v327_v39, %v275_v37  ;;  %v357_v45 = vsel %vm356_vm1, %v473_v47, %v353_v38 }
 0x162   :  { %v374_v49 = vmul.f32 %v357_v45, %v278_v40  ;;  %v361_v52 = vmul.f32 0.5, %v360_v41 }
 0x163   :  { %v380_v50 = vmul.f32 %v678_v0, %v371_v42 }
 0x164   :  { %v477_v54 = vpop.eup %476  ;;  %v383_v51 = vmul.f32 %v678_v0, %v374_v49  ;;  %v362_v13 = vsub.f32 1.5, %v361_v52 }
 0x165   :  { %v389_v48 = vadd.f32 %v682_v5, %v380_v50  ;;  %v339_v55 = vmul.f32 %v477_v54, %v285_v31  ;;  %vm345_vm5 = vweird.f32 %v477_v54 }
 0x166   :  { %v392_v56 = vadd.f32 %v682_v5, %v383_v51  ;;  %v363_v57 = vmul.f32 %v475_v32, %v362_v13  ;;  %vm346_vm7 = vmor %vm344_vm6, %vm345_vm5 }
 0x167   :  { %397 = vst [vmem:[#allocation8 + $0x18] sm:$0xff] %v389_v48  ;;  %v340_v22 = vmul.f32 %v477_v54, %v339_v55 }
 0x168   :  { %400 = vst [vmem:[#allocation8 + $0x30] sm:$0xff] %v392_v56  ;;  %v367_v62 = vsel %vm366_vm4, %v475_v32, %v363_v57 }
 0x169   :  { %v375_v36 = vmul.f32 %v367_v62, %v279_v18  ;;  %v341_v58 = vmul.f32 0.5, %v340_v22 }
 0x16b   :  { %v384_v59 = vmul.f32 %v678_v0, %v375_v36  ;;  %v342_v60 = vsub.f32 1.5, %v341_v58 }
 0x16d   :  { %v393_v63 = vadd.f32 %v682_v5, %v384_v59  ;;  %v343_v1 = vmul.f32 %v477_v54, %v342_v60 }
 0x16f   :  { %401 = vst [vmem:[#allocation8 + $0x38] sm:$0xff] %v393_v63  ;;  %v347_v23 = vsel %vm346_vm7, %v477_v54, %v343_v1 }
 0x170   :  { %v373_v44 = vmul.f32 %v347_v23, %v277_v2 }
 0x172   :  { %v382_v3 = vmul.f32 %v678_v0, %v373_v44 }
 0x174   :  { %v391_v4 = vadd.f32 %v682_v5, %v382_v3 }
 0x176   :  { %399 = vst [vmem:[#allocation8 + $0x28] sm:$0xff] %v391_v4 }
 0x177   :  { %414 = dma.vmem_to_hbm [thread:$0]  %s407_s29, 1024, %s409_s5, [#allocation4], %s581_s20, %s581_s20, %s582_s21  }
 0x178   :  { %578 = dma.done.wait [#allocation4], 1024  }
 0x179   :  { %579 = vsyncadd [#allocation4], 4294966272 }
 0x17a   :  { %419 = vsyncpa [#allocation3], 1 }
 0x17b   :  { %420 = vsyncpa [#allocation6], 1 }
 0x17c   :  { %421 = vsyncpa [#allocation4], 1 }

// kernel: tpu_custom_call.1
= control target key start
LH: loop header
LB: loop body
LE: loop exit
PB: predicated region body
PF: predicated region fallthrough
CT: control target
= control target key end

     0   :  { %8 = vsyncpa [#allocation3], 0  ;;  %s753_s0 = inlined_call_operand.hbm [shape: f32[64,256], index: 0, kind: input, shape index: {}]   ;;  %s754_s1 = inlined_call_operand.hbm [shape: f32[256,128], index: 1, kind: input, shape index: {}]   ;;  %s755_s2 = inlined_call_operand.hbm [shape: f32[8,128], index: 2, kind: input, shape index: {}]   ;;  %s756_s3 = inlined_call_operand.hbm [shape: f32[64,128], index: 3, kind: output, shape index: {}]  }
   0x1   :  { %9 = vsyncpa [#allocation6], 0  ;;  %s28_s14 = sshll.u32 %s754_s1, 4  ;;  %s29_s14 = int_to_ptr.hbm [resolvable:$true] %s28_s14 }
   0x2   :  { %10 = vsyncpa [#allocation4], 0  ;;  %s580_s15 = smov [#allocation5]   ;;  %s15_s19 = sshll.u32 %s753_s0, 4  ;;  %s16_s19 = int_to_ptr.hbm [resolvable:$true] %s15_s19 }
   0x3   :  { %s30_s16 = sshll.u32 %s580_s15, 4  ;;  %s581_s20 = smov 128   ;;  %s31_s16 = int_to_ptr.vmem [resolvable:$true] %s30_s16 }
   0x4   :  { %s582_s21 = smov 8   ;;  %s583_s22 = smov [#allocation2]  }
   0x5   :  { %36 = dma.hbm_to_vmem [thread:$0]  %s29_s14, 4096, %s31_s16, [#allocation6], %s581_s20, %s581_s20, %s582_s21  }
   0x6   :  { %s17_s23 = sshll.u32 %s583_s22, 4  ;;  %s584_s1 = smov 256   ;;  %s18_s23 = int_to_ptr.vmem [resolvable:$true] %s17_s23 }
   0x7   :  { %s585_s24 = smov 16   ;;  %s42_s27 = sshll.u32 %s755_s2, 4  ;;  %s43_s27 = int_to_ptr.hbm [resolvable:$true] %s42_s27 }
   0x8   :  { %23 = dma.hbm_to_vmem [thread:$0]  %s16_s19, 2048, %s18_s23, [#allocation3], %s584_s1, %s584_s1, %s585_s24  }
   0x9   :  { %s586_s28 = smov [#allocation7]  }
   0xa   :  { %s44_s0 = sshll.u32 %s586_s28, 4  ;;  %s45_s0 = int_to_ptr.vmem [resolvable:$true] %s44_s0 }
   0xb   :  { %47 = dma.hbm_to_vmem [thread:$0]  %s43_s27, 128, %s45_s0, [#allocation6]  }
   0xc   :  { %574 = dma.done.wait [#allocation3], 2048  }
   0xd   :  { %575 = vsyncadd [#allocation3], 4294965248 }
   0xe   :  { %576 = dma.done.wait [#allocation6], 4224  }
   0xf   :  { %577 = vsyncadd [#allocation6], 4294963072  ;;  %v91_v0 = vld [vmem:[#allocation5 + $0x78] sm:$0xff]  ;;  %v90_v1 = vld [vmem:[#allocation5 + $0x70] sm:$0xff]  ;;  %s587_s2 = smov [#allocation8]   ;;  %s408_s5 = sshll.u32 %s756_s3, 4  ;;  %s409_s5 = int_to_ptr.hbm [resolvable:$true] %s408_s5 }
  0x10   :  { %v107_v2 = vld [vmem:[#allocation5 + $0xf8] sm:$0xff]  ;;  %110 = vmatpush.msra.mxu0 %v91_v0  ;;  %v106_v3 = vld [vmem:[#allocation5 + $0xf0] sm:$0xff]  ;;  %422 = vmatpush.msra.mxu2 %v91_v0  ;;  %v89_v4 = vld [vmem:[#allocation5 + $0x68] sm:$0xff]  ;;  %s406_s29 = sshll.u32 %s587_s2, 4  ;;  %s407_s29 = int_to_ptr.vmem [resolvable:$true] %s406_s29 }
  0x11   :  { %151 = vmatpush.msra.mxu1 %v107_v2  ;;  %438 = vmatpush.msra.mxu3 %v107_v2  ;;  %v105_v5 = vld [vmem:[#allocation5 + $0xe8] sm:$0xff]  ;;  %v88_v6 = vld [vmem:[#allocation5 + $0x60] sm:$0xff]  ;;  %v87_v8 = vld [vmem:[#allocation5 + $0x58] sm:$0xff] }
  0x12   :  { %111 = vmatpush.msra.mxu0 %v90_v1  ;;  %423 = vmatpush.msra.mxu2 %v90_v1  ;;  %v104_v7 = vld [vmem:[#allocation5 + $0xe0] sm:$0xff]  ;;  %v103_v9 = vld [vmem:[#allocation5 + $0xd8] sm:$0xff]  ;;  %v86_v10 = vld [vmem:[#allocation5 + $0x50] sm:$0xff] }
  0x13   :  { %152 = vmatpush.msra.mxu1 %v106_v3  ;;  %439 = vmatpush.msra.mxu3 %v106_v3  ;;  %v102_v11 = vld [vmem:[#allocation5 + $0xd0] sm:$0xff]  ;;  %v85_v12 = vld [vmem:[#allocation5 + $0x48] sm:$0xff]  ;;  %v84_v14 = vld [vmem:[#allocation5 + $0x40] sm:$0xff] }
  0x14   :  { %112 = vmatpush.msra.mxu0 %v89_v4  ;;  %424 = vmatpush.msra.mxu2 %v89_v4  ;;  %v101_v13 = vld [vmem:[#allocation5 + $0xc8] sm:$0xff]  ;;  %v100_v15 = vld [vmem:[#allocation5 + $0xc0] sm:$0xff]  ;;  %v83_v16 = vld [vmem:[#allocation5 + $0x38] sm:$0xff] }
  0x15   :  { %153 = vmatpush.msra.mxu1 %v105_v5  ;;  %440 = vmatpush.msra.mxu3 %v105_v5  ;;  %v99_v17 = vld [vmem:[#allocation5 + $0xb8] sm:$0xff]  ;;  %v82_v18 = vld [vmem:[#allocation5 + $0x30] sm:$0xff]  ;;  %v81_v20 = vld [vmem:[#allocation5 + $0x28] sm:$0xff] }
  0x16   :  { %113 = vmatpush.msra.mxu0 %v88_v6  ;;  %425 = vmatpush.msra.mxu2 %v88_v6  ;;  %v98_v19 = vld [vmem:[#allocation5 + $0xb0] sm:$0xff]  ;;  %v97_v21 = vld [vmem:[#allocation5 + $0xa8] sm:$0xff]  ;;  %v80_v22 = vld [vmem:[#allocation5 + $0x20] sm:$0xff] }
  0x17   :  { %154 = vmatpush.msra.mxu1 %v104_v7  ;;  %441 = vmatpush.msra.mxu3 %v104_v7  ;;  %v96_v23 = vld [vmem:[#allocation5 + $0xa0] sm:$0xff]  ;;  %v79_v24 = vld [vmem:[#allocation5 + $0x18] sm:$0xff]  ;;  %v78_v26 = vld [vmem:[#allocation5 + $0x10] sm:$0xff] }
  0x18   :  { %114 = vmatpush.msra.mxu0 %v87_v8  ;;  %426 = vmatpush.msra.mxu2 %v87_v8  ;;  %v95_v25 = vld [vmem:[#allocation5 + $0x98] sm:$0xff]  ;;  %v94_v27 = vld [vmem:[#allocation5 + $0x90] sm:$0xff]  ;;  %v77_v28 = vld [vmem:[#allocation5 + $0x8] sm:$0xff] }
  0x19   :  { %155 = vmatpush.msra.mxu1 %v103_v9  ;;  %442 = vmatpush.msra.mxu3 %v103_v9  ;;  %v93_v29 = vld [vmem:[#allocation5 + $0x88] sm:$0xff]  ;;  %v76_v30 = vld [vmem:[#allocation5] sm:$0xff]  ;;  %v62_v36 = vld [vmem:[#allocation2 + $0x10] sm:$0xff] }
  0x1a   :  { %115 = vmatpush.msra.mxu0 %v86_v10  ;;  %427 = vmatpush.msra.mxu2 %v86_v10  ;;  %v92_v31 = vld [vmem:[#allocation5 + $0x80] sm:$0xff]  ;;  %v61_v33 = vld [vmem:[#allocation2 + $0x8] sm:$0xff]  ;;  %v63_v37 = vld [vmem:[#allocation2 + $0x18] sm:$0xff] }
  0x1b   :  { %156 = vmatpush.msra.mxu1 %v102_v11  ;;  %443 = vmatpush.msra.mxu3 %v102_v11  ;;  %v60_v32 = vld [vmem:[#allocation2] sm:$0xff]  ;;  %v69_v35 = vld [vmem:[#allocation2 + $0x48] sm:$0xff]  ;;  %v70_v38 = vld [vmem:[#allocation2 + $0x50] sm:$0xff] }
  0x1c   :  { %116 = vmatpush.msra.mxu0 %v85_v12  ;;  %428 = vmatpush.msra.mxu2 %v85_v12  ;;  %v68_v34 = vld [vmem:[#allocation2 + $0x40] sm:$0xff]  ;;  %v71_v39 = vld [vmem:[#allocation2 + $0x58] sm:$0xff]  ;;  %v65_v41 = vld [vmem:[#allocation2 + $0x28] sm:$0xff] }
  0x1d   :  { %157 = vmatpush.msra.mxu1 %v101_v13  ;;  %444 = vmatpush.msra.mxu3 %v101_v13  ;;  %v64_v40 = vld [vmem:[#allocation2 + $0x20] sm:$0xff]  ;;  %v73_v43 = vld [vmem:[#allocation2 + $0x68] sm:$0xff]  ;;  %v66_v44 = vld [vmem:[#allocation2 + $0x30] sm:$0xff] }
  0x1e   :  { %117 = vmatpush.msra.mxu0 %v84_v14  ;;  %429 = vmatpush.msra.mxu2 %v84_v14  ;;  %v72_v42 = vld [vmem:[#allocation2 + $0x60] sm:$0xff]  ;;  %v67_v45 = vld [vmem:[#allocation2 + $0x38] sm:$0xff]  ;;  %v74_v46 = vld [vmem:[#allocation2 + $0x70] sm:$0xff] }
  0x1f   :  { %158 = vmatpush.msra.mxu1 %v100_v15  ;;  %445 = vmatpush.msra.mxu3 %v100_v15  ;;  %v75_v47 = vld [vmem:[#allocation2 + $0x78] sm:$0xff]  ;;  %v620_v48 = vld [vmem:[#allocation7] sm:$0xff] }
  0x20   :  { %118 = vmatpush.msra.mxu0 %v83_v16  ;;  %430 = vmatpush.msra.mxu2 %v83_v16  ;;  %v109_v49 = vperm.slane %v620_v48, 0 }
  0x21   :  { %159 = vmatpush.msra.mxu1 %v99_v17  ;;  %446 = vmatpush.msra.mxu3 %v99_v17 }
  0x22   :  { %119 = vmatpush.msra.mxu0 %v82_v18  ;;  %431 = vmatpush.msra.mxu2 %v82_v18 }
  0x23   :  { %160 = vmatpush.msra.mxu1 %v98_v19  ;;  %447 = vmatpush.msra.mxu3 %v98_v19 }
  0x24   :  { %120 = vmatpush.msra.mxu0 %v81_v20  ;;  %432 = vmatpush.msra.mxu2 %v81_v20 }
  0x25   :  { %161 = vmatpush.msra.mxu1 %v97_v21  ;;  %448 = vmatpush.msra.mxu3 %v97_v21 }
  0x26   :  { %121 = vmatpush.msra.mxu0 %v80_v22  ;;  %433 = vmatpush.msra.mxu2 %v80_v22 }
  0x27   :  { %162 = vmatpush.msra.mxu1 %v96_v23  ;;  %449 = vmatpush.msra.mxu3 %v96_v23 }
  0x28   :  { %122 = vmatpush.msra.mxu0 %v79_v24  ;;  %434 = vmatpush.msra.mxu2 %v79_v24 }
  0x29   :  { %163 = vmatpush.msra.mxu1 %v95_v25  ;;  %450 = vmatpush.msra.mxu3 %v95_v25 }
  0x2a   :  { %123 = vmatpush.msra.mxu0 %v78_v26  ;;  %435 = vmatpush.msra.mxu2 %v78_v26 }
  0x2b   :  { %164 = vmatpush.msra.mxu1 %v94_v27  ;;  %451 = vmatpush.msra.mxu3 %v94_v27 }
  0x2c   :  { %124 = vmatpush.msra.mxu0 %v77_v28  ;;  %436 = vmatpush.msra.mxu2 %v77_v28 }
  0x2d   :  { %165 = vmatpush.msra.mxu1 %v93_v29  ;;  %452 = vmatpush.msra.mxu3 %v93_v29 }
  0x2e   :  { %125 = vmatpush.msra.mxu0 %v76_v30  ;;  %437 = vmatpush.msra.mxu2 %v76_v30 }
  0x2f   :  { %166 = vmatpush.msra.mxu1 %v92_v31  ;;  %126 = vmatmul.f32.vlgmr.msra.gmra.mxu0 %v60_v32 }
  0x30   :  { %167 = vmatmul.f32.vlgmr.msra.gmra.mxu1 %v61_v33  ;;  %453 = vmatpush.msra.mxu3 %v92_v31 }
  0x31   :  { %138 = vmatmul.f32.vlgmr.msra.gmra.mxu2 %v68_v34  ;;  %179 = vmatmul.f32.vlgmr.msra.gmra.mxu3 %v69_v35 }
  0x37   :  { %129 = vmatmul.f32.gmra.mxu0 %v62_v36 }
  0x38   :  { %170 = vmatmul.f32.gmra.mxu1 %v63_v37 }
  0x39   :  { %141 = vmatmul.f32.gmra.mxu2 %v70_v38  ;;  %182 = vmatmul.f32.gmra.mxu3 %v71_v39 }
  0x3f   :  { %132 = vmatmul.f32.gmra.mxu0 %v64_v40 }
  0x40   :  { %173 = vmatmul.f32.gmra.mxu1 %v65_v41 }
  0x41   :  { %144 = vmatmul.f32.gmra.mxu2 %v72_v42  ;;  %185 = vmatmul.f32.gmra.mxu3 %v73_v43 }
  0x47   :  { %135 = vmatmul.f32.gmra.mxu0 %v66_v44 }
  0x48   :  { %176 = vmatmul.f32.gmra.mxu1 %v67_v45 }
  0x49   :  { %147 = vmatmul.f32.gmra.mxu2 %v74_v46  ;;  %188 = vmatmul.f32.gmra.mxu3 %v75_v47 }
  0xac   :  { %v127_v50 = vpop.f32.mrf.mxu0 }
  0xad   :  { %v168_v51 = vpop.f32.mrf.mxu1  ;;  %v128_v52 = vadd.f32 %v127_v50, %v109_v49 }
  0xaf   :  { %v623_v53 = vadd.f32 %v168_v51, %v128_v52 }
  0xb1   :  { %192 = vadd.xlane.f32.xlu0 %v623_v53  ;;  %v208_v54 = vmul.f32 %v623_v53, %v623_v53 }
  0xb3   :  { %216 = vadd.xlane.f32.xlu2 %v208_v54 }
  0xb4   :  { %v130_v55 = vpop.f32.mrf.mxu0  ;;  %v139_v56 = vpop.f32.mrf.mxu2 }
  0xb5   :  { %v131_v57 = vadd.f32 %v130_v55, %v109_v49  ;;  %v140_v58 = vadd.f32 %v139_v56, %v109_v49  ;;  %v171_v59 = vpop.f32.mrf.mxu1  ;;  %v180_v60 = vpop.f32.mrf.mxu3 }
  0xb7   :  { %v628_v61 = vadd.f32 %v171_v59, %v131_v57  ;;  %v630_v62 = vadd.f32 %v180_v60, %v140_v58 }
  0xb9   :  { %194 = vadd.xlane.f32.xlu0 %v628_v61  ;;  %v212_v5 = vmul.f32 %v630_v62, %v630_v62  ;;  %v209_v15 = vmul.f32 %v628_v61, %v628_v61 }
  0xbb   :  { %200 = vadd.xlane.f32.xlu2 %v630_v62 }
  0xbc   :  { %v133_v63 = vpop.f32.mrf.mxu0  ;;  %v142_v0 = vpop.f32.mrf.mxu2 }
  0xbd   :  { %v134_v1 = vadd.f32 %v133_v63, %v109_v49  ;;  %v143_v2 = vadd.f32 %v142_v0, %v109_v49  ;;  %v174_v3 = vpop.f32.mrf.mxu1  ;;  %v183_v4 = vpop.f32.mrf.mxu3  ;;  %v678_v0 = vperm.slane %v620_v48, 1 }
  0xbf   :  { %v636_v6 = vadd.f32 %v174_v3, %v134_v1  ;;  %v638_v7 = vadd.f32 %v183_v4, %v143_v2 }
  0xc1   :  { %196 = vadd.xlane.f32.xlu1 %v636_v6  ;;  %224 = vadd.xlane.f32.xlu0 %v212_v5  ;;  %v210_v14 = vmul.f32 %v636_v6, %v636_v6  ;;  %v213_v25 = vmul.f32 %v638_v7, %v638_v7  ;;  %v682_v5 = vperm.slane %v620_v48, 2 }
  0xc3   :  { %202 = vadd.xlane.f32.xlu2 %v638_v7 }
  0xc4   :  { %v136_v8 = vpop.f32.mrf.mxu0  ;;  %v145_v9 = vpop.f32.mrf.mxu2 }
  0xc5   :  { %v137_v10 = vadd.f32 %v136_v8, %v109_v49  ;;  %v177_v11 = vpop.f32.mrf.mxu1  ;;  %v186_v12 = vpop.f32.mrf.mxu3  ;;  %v146_v16 = vadd.f32 %v145_v9, %v109_v49 }
  0xc7   :  { %v642_v13 = vadd.f32 %v177_v11, %v137_v10  ;;  %v650_v18 = vadd.f32 %v186_v12, %v146_v16 }
  0xc9   :  { %220 = vadd.xlane.f32.xlu1 %v210_v14  ;;  %218 = vadd.xlane.f32.xlu0 %v209_v15  ;;  %v211_v17 = vmul.f32 %v642_v13, %v642_v13  ;;  %v214_v22 = vmul.f32 %v650_v18, %v650_v18 }
  0xcb   :  { %222 = vadd.xlane.f32.xlu2 %v211_v17 }
  0xcc   :  { %v148_v19 = vpop.f32.mrf.mxu2 }
  0xcd   :  { %v149_v20 = vadd.f32 %v148_v19, %v109_v49  ;;  %v189_v21 = vpop.f32.mrf.mxu3 }
  0xcf   :  { %v656_v23 = vadd.f32 %v189_v21, %v149_v20 }
  0xd1   :  { %198 = vadd.xlane.f32.xlu1 %v642_v13  ;;  %204 = vadd.xlane.f32.xlu0 %v650_v18  ;;  %v215_v24 = vmul.f32 %v656_v23, %v656_v23 }
  0xd3   :  { %228 = vadd.xlane.f32.xlu2 %v214_v22 }
  0xd9   :  { %206 = vadd.xlane.f32.xlu1 %v656_v23  ;;  %230 = vadd.xlane.f32.xlu0 %v215_v24 }
  0xe1   :  { %226 = vadd.xlane.f32.xlu1 %v213_v25 }
 0x124   :  { %v193_v26 = vpop.xlane.xlu0 %192 }
 0x125   :  { %v232_v27 = vmul.f32 0.0078125, %v193_v26 }
 0x126   :  { %v217_v28 = vpop.xlane.xlu2 %216 }
 0x127   :  { %v248_v29 = vmul.f32 %v232_v27, %v232_v27  ;;  %v240_v30 = vmul.f32 0.0078125, %v217_v28  ;;  %v272_v1 = vsub.f32 %v623_v53, %v232_v27 }
 0x129   :  { %v256_v31 = vsub.f32 %v240_v30, %v248_v29 }
 0x12b   :  { %v264_v32 = vmax.f32 %v256_v31, 0.0 }
 0x12c   :  { %v195_v33 = vpop.xlane.xlu0 %194 }
 0x12d   :  { %v280_v34 = vadd.f32 1e-05, %v264_v32  ;;  %v669_v46 = vmul.f32 0.0078125, %v195_v33 }
 0x12e   :  { %v201_v35 = vpop.xlane.xlu2 %200 }
 0x12f   :  { %462 = vrsqrt.f32 %v280_v34  ;;  %v663_v36 = vmul.f32 0.0078125, %v201_v35  ;;  %v249_v54 = vmul.f32 %v669_v46, %v669_v46  ;;  %vm294_vm1 = vweird.f32 %v280_v34 }
 0x131   :  { %v252_v37 = vmul.f32 %v663_v36, %v663_v36 }
 0x134   :  { %v197_v38 = vpop.xlane.xlu1 %196  ;;  %v225_v39 = vpop.xlane.xlu0 %224 }
 0x135   :  { %v463_v40 = vpop.eup %462  ;;  %v244_v41 = vmul.f32 0.0078125, %v225_v39  ;;  %v671_v47 = vmul.f32 0.0078125, %v197_v38 }
 0x136   :  { %v289_v42 = vmul.f32 %v463_v40, %v280_v34  ;;  %v667_v43 = vpop.xlane.xlu2 %202  ;;  %vm295_vm0 = vweird.f32 %v463_v40 }
 0x137   :  { %v260_v44 = vsub.f32 %v244_v41, %v252_v37  ;;  %v250_v57 = vmul.f32 %v671_v47, %v671_v47  ;;  %vm296_vm2 = vmor %vm294_vm1, %vm295_vm0 }
 0x138   :  { %v290_v45 = vmul.f32 %v463_v40, %v289_v42 }
 0x139   :  { %v268_v49 = vmax.f32 %v260_v44, 0.0 }
 0x13a   :  { %v291_v50 = vmul.f32 0.5, %v290_v45 }
 0x13b   :  { %v284_v51 = vadd.f32 1e-05, %v268_v49 }
 0x13c   :  { %v292_v52 = vsub.f32 1.5, %v291_v50  ;;  %v221_v55 = vpop.xlane.xlu1 %220  ;;  %v219_v56 = vpop.xlane.xlu0 %218 }
 0x13d   :  { %464 = vrsqrt.f32 %v284_v51  ;;  %v242_v58 = vmul.f32 0.0078125, %v221_v55  ;;  %v241_v59 = vmul.f32 0.0078125, %v219_v56  ;;  %vm334_vm4 = vweird.f32 %v284_v51 }
 0x13e   :  { %v293_v60 = vmul.f32 %v463_v40, %v292_v52  ;;  %v223_v63 = vpop.xlane.xlu2 %222 }
 0x13f   :  { %v258_v2 = vsub.f32 %v242_v58, %v250_v57  ;;  %v257_v3 = vsub.f32 %v241_v59, %v249_v54  ;;  %v243_v20 = vmul.f32 0.0078125, %v223_v63 }
 0x140   :  { %v297_v4 = vsel %vm296_vm2, %v463_v40, %v293_v60  ;;  %v276_v40 = vsub.f32 %v630_v62, %v663_v36 }
 0x141   :  { %v368_v8 = vmul.f32 %v297_v4, %v272_v1  ;;  %v266_v9 = vmax.f32 %v258_v2, 0.0  ;;  %v265_v10 = vmax.f32 %v257_v3, 0.0  ;;  %v274_v1 = vsub.f32 %v636_v6, %v671_v47 }
 0x143   :  { %v465_v11 = vpop.eup %464  ;;  %v377_v12 = vmul.f32 %v678_v0, %v368_v8  ;;  %v282_v14 = vadd.f32 1e-05, %v266_v9  ;;  %v685_v15 = vadd.f32 1e-05, %v265_v10  ;;  %v715_v8 = vmul.f32 0.0078125, %v667_v43 }
 0x144   :  { %v329_v16 = vmul.f32 %v465_v11, %v284_v51  ;;  %v199_v17 = vpop.xlane.xlu1 %198  ;;  %v205_v19 = vpop.xlane.xlu0 %204  ;;  %vm335_vm3 = vweird.f32 %v465_v11 }
 0x145   :  { %v386_v53 = vadd.f32 %v682_v5, %v377_v12  ;;  %466 = vrsqrt.f32 %v282_v14  ;;  %v689_v48 = vmul.f32 0.0078125, %v199_v17  ;;  %v691_v22 = vmul.f32 0.0078125, %v205_v19  ;;  %vm336_vm5 = vmor %vm334_vm4, %vm335_vm3 }
 0x146   :  { %v330_v21 = vmul.f32 %v465_v11, %v329_v16  ;;  %468 = vrsqrt.f32 %v685_v15  ;;  %v229_v24 = vpop.xlane.xlu2 %228  ;;  %vm314_vm8 = vweird.f32 %v282_v14  ;;  %vm304_vm10 = vweird.f32 %v685_v15 }
 0x147   :  { %394 = vst [vmem:[#allocation8] sm:$0xff] %v386_v53  ;;  %v246_v25 = vmul.f32 0.0078125, %v229_v24  ;;  %v251_v27 = vmul.f32 %v689_v48, %v689_v48  ;;  %v254_v28 = vmul.f32 %v691_v22, %v691_v22  ;;  %v273_v12 = vsub.f32 %v628_v61, %v669_v46 }
 0x148   :  { %v331_v26 = vmul.f32 0.5, %v330_v21 }
 0x149   :  { %v259_v30 = vsub.f32 %v243_v20, %v251_v27  ;;  %v262_v31 = vsub.f32 %v246_v25, %v254_v28 }
 0x14a   :  { %v332_v29 = vsub.f32 1.5, %v331_v26 }
 0x14b   :  { %v467_v32 = vpop.eup %466  ;;  %v267_v37 = vmax.f32 %v259_v30, 0.0  ;;  %v270_v42 = vmax.f32 %v262_v31, 0.0 }
 0x14c   :  { %v469_v33 = vpop.eup %468  ;;  %v333_v34 = vmul.f32 %v465_v11, %v332_v29  ;;  %v309_v35 = vmul.f32 %v467_v32, %v282_v14  ;;  %v207_v38 = vpop.xlane.xlu1 %206  ;;  %vm315_vm6 = vweird.f32 %v467_v32  ;;  %v253_v14 = vmul.f32 %v715_v8, %v715_v8 }
 0x14d   :  { %v231_v39 = vpop.xlane.xlu0 %230  ;;  %v299_v41 = vmul.f32 %v469_v33, %v685_v15  ;;  %v700_v44 = vmul.f32 0.0078125, %v207_v38  ;;  %v702_v50 = vadd.f32 1e-05, %v267_v37  ;;  %v704_v55 = vadd.f32 1e-05, %v270_v42  ;;  %vm316_vm9 = vmor %vm314_vm8, %vm315_vm6 }
 0x14e   :  { %v337_v45 = vsel %vm336_vm5, %v465_v11, %v333_v34  ;;  %v310_v49 = vmul.f32 %v467_v32, %v309_v35  ;;  %v247_v52 = vmul.f32 0.0078125, %v231_v39  ;;  %vm305_vm7 = vweird.f32 %v469_v33 }
 0x14f   :  { %v372_v54 = vmul.f32 %v337_v45, %v276_v40  ;;  %v300_v51 = vmul.f32 %v469_v33, %v299_v41  ;;  %v255_v56 = vmul.f32 %v700_v44, %v700_v44  ;;  %470 = vrsqrt.f32 %v702_v50  ;;  %vm306_vm11 = vmor %vm304_vm10, %vm305_vm7 }
 0x150   :  { %v311_v57 = vmul.f32 0.5, %v310_v49  ;;  %472 = vrsqrt.f32 %v704_v55  ;;  %vm324_vm14 = vweird.f32 %v702_v50  ;;  %v275_v37 = vsub.f32 %v642_v13, %v689_v48 }
 0x151   :  { %v381_v62 = vmul.f32 %v678_v0, %v372_v54  ;;  %v301_v36 = vmul.f32 0.5, %v300_v51  ;;  %v263_v59 = vsub.f32 %v247_v52, %v255_v56  ;;  %vm354_vm0 = vweird.f32 %v704_v55 }
 0x152   :  { %v312_v58 = vsub.f32 1.5, %v311_v57  ;;  %v278_v40 = vsub.f32 %v650_v18, %v691_v22  ;;  %v279_v18 = vsub.f32 %v656_v23, %v700_v44 }
 0x153   :  { %v390_v60 = vadd.f32 %v682_v5, %v381_v62  ;;  %v302_v63 = vsub.f32 1.5, %v301_v36  ;;  %v271_v3 = vmax.f32 %v263_v59, 0.0 }
 0x154   :  { %v313_v2 = vmul.f32 %v467_v32, %v312_v58  ;;  %v227_v4 = vpop.xlane.xlu1 %226 }
 0x155   :  { %398 = vst [vmem:[#allocation8 + $0x20] sm:$0xff] %v390_v60  ;;  %v303_v9 = vmul.f32 %v469_v33, %v302_v63  ;;  %v245_v10 = vmul.f32 0.0078125, %v227_v4  ;;  %v471_v11 = vpop.eup %470  ;;  %v287_v6 = vadd.f32 1e-05, %v271_v3 }
 0x156   :  { %v317_v16 = vsel %vm316_vm9, %v467_v32, %v313_v2  ;;  %v473_v47 = vpop.eup %472  ;;  %v319_v19 = vmul.f32 %v471_v11, %v702_v50  ;;  %vm325_vm12 = vweird.f32 %v471_v11  ;;  %v277_v2 = vsub.f32 %v638_v7, %v715_v8 }
 0x157   :  { %v370_v17 = vmul.f32 %v317_v16, %v274_v1  ;;  %v307_v43 = vsel %vm306_vm11, %v469_v33, %v303_v9  ;;  %v349_v15 = vmul.f32 %v473_v47, %v704_v55  ;;  %474 = vrsqrt.f32 %v287_v6  ;;  %vm326_vm15 = vmor %vm324_vm14, %vm325_vm12 }
 0x158   :  { %v369_v53 = vmul.f32 %v307_v43, %v273_v12  ;;  %v320_v21 = vmul.f32 %v471_v11, %v319_v19  ;;  %v261_v61 = vsub.f32 %v245_v10, %v253_v14  ;;  %vm355_vm13 = vweird.f32 %v473_v47 }
 0x159   :  { %v379_v20 = vmul.f32 %v678_v0, %v370_v17  ;;  %v350_v24 = vmul.f32 %v473_v47, %v349_v15  ;;  %vm356_vm1 = vmor %vm354_vm0, %vm355_vm13  ;;  %vm364_vm3 = vweird.f32 %v287_v6 }
 0x15a   :  { %v378_v46 = vmul.f32 %v678_v0, %v369_v53  ;;  %v321_v26 = vmul.f32 0.5, %v320_v21  ;;  %v269_v27 = vmax.f32 %v261_v61, 0.0 }
 0x15b   :  { %v388_v25 = vadd.f32 %v682_v5, %v379_v20  ;;  %v351_v29 = vmul.f32 0.5, %v350_v24 }
 0x15c   :  { %v387_v28 = vadd.f32 %v682_v5, %v378_v46  ;;  %v322_v30 = vsub.f32 1.5, %v321_v26  ;;  %v285_v31 = vadd.f32 1e-05, %v269_v27 }
 0x15d   :  { %396 = vst [vmem:[#allocation8 + $0x10] sm:$0xff] %v388_v25  ;;  %v475_v32 = vpop.eup %474  ;;  %v352_v33 = vsub.f32 1.5, %v351_v29 }
 0x15e   :  { %395 = vst [vmem:[#allocation8 + $0x8] sm:$0xff] %v387_v28  ;;  %v323_v34 = vmul.f32 %v471_v11, %v322_v30  ;;  %v359_v35 = vmul.f32 %v475_v32, %v287_v6  ;;  %476 = vrsqrt.f32 %v285_v31  ;;  %vm365_vm2 = vweird.f32 %v475_v32 }
 0x15f   :  { %v353_v38 = vmul.f32 %v473_v47, %v352_v33  ;;  %vm366_vm4 = vmor %vm364_vm3, %vm365_vm2  ;;  %vm344_vm6 = vweird.f32 %v285_v31 }
 0x160   :  { %v327_v39 = vsel %vm326_vm15, %v471_v11, %v323_v34  ;;  %v360_v41 = vmul.f32 %v475_v32, %v359_v35 }
 0x161   :  { %v371_v42 = vmul.f32 %v327_v39, %v275_v37  ;;  %v357_v45 = vsel %vm356_vm1, %v473_v47, %v353_v38 }
 0x162   :  { %v374_v49 = vmul.f32 %v357_v45, %v278_v40  ;;  %v361_v52 = vmul.f32 0.5, %v360_v41 }
 0x163   :  { %v380_v50 = vmul.f32 %v678_v0, %v371_v42 }
 0x164   :  { %v477_v54 = vpop.eup %476  ;;  %v383_v51 = vmul.f32 %v678_v0, %v374_v49  ;;  %v362_v13 = vsub.f32 1.5, %v361_v52 }
 0x165   :  { %v389_v48 = vadd.f32 %v682_v5, %v380_v50  ;;  %v339_v55 = vmul.f32 %v477_v54, %v285_v31  ;;  %vm345_vm5 = vweird.f32 %v477_v54 }
 0x166   :  { %v392_v56 = vadd.f32 %v682_v5, %v383_v51  ;;  %v363_v57 = vmul.f32 %v475_v32, %v362_v13  ;;  %vm346_vm7 = vmor %vm344_vm6, %vm345_vm5 }
 0x167   :  { %397 = vst [vmem:[#allocation8 + $0x18] sm:$0xff] %v389_v48  ;;  %v340_v22 = vmul.f32 %v477_v54, %v339_v55 }
 0x168   :  { %400 = vst [vmem:[#allocation8 + $0x30] sm:$0xff] %v392_v56  ;;  %v367_v62 = vsel %vm366_vm4, %v475_v32, %v363_v57 }
 0x169   :  { %v375_v36 = vmul.f32 %v367_v62, %v279_v18  ;;  %v341_v58 = vmul.f32 0.5, %v340_v22 }
 0x16b   :  { %v384_v59 = vmul.f32 %v678_v0, %v375_v36  ;;  %v342_v60 = vsub.f32 1.5, %v341_v58 }
 0x16d   :  { %v393_v63 = vadd.f32 %v682_v5, %v384_v59  ;;  %v343_v1 = vmul.f32 %v477_v54, %v342_v60 }
 0x16f   :  { %401 = vst [vmem:[#allocation8 + $0x38] sm:$0xff] %v393_v63  ;;  %v347_v23 = vsel %vm346_vm7, %v477_v54, %v343_v1 }
 0x170   :  { %v373_v44 = vmul.f32 %v347_v23, %v277_v2 }
 0x172   :  { %v382_v3 = vmul.f32 %v678_v0, %v373_v44 }
 0x174   :  { %v391_v4 = vadd.f32 %v682_v5, %v382_v3 }
 0x176   :  { %399 = vst [vmem:[#allocation8 + $0x28] sm:$0xff] %v391_v4 }
 0x177   :  { %414 = dma.vmem_to_hbm [thread:$0]  %s407_s29, 1024, %s409_s5, [#allocation4], %s581_s20, %s581_s20, %s582_s21  }
 0x178   :  { %578 = dma.done.wait [#allocation4], 1024  }
 0x179   :  { %579 = vsyncadd [#allocation4], 4294966272 }
 0x17a   :  { %419 = vsyncpa [#allocation3], 1 }
 0x17b   :  { %420 = vsyncpa [#allocation6], 1 }
 0x17c   :  { %421 = vsyncpa [#allocation4], 1 }

</bundles_post_ra>
